<compile_context>
chip_gen: v7x
topology: tpu7x:2x2x1
jax: 0.10.0
libtpu: 0.0.40
codegen_flags: <defaults>
</compile_context>

<pallas_src>
import jax
import jax.numpy as jnp
from jax.experimental import pallas as pl
from jax.experimental.pallas import tpu as pltpu


_COMPUTE_DTYPE = jnp.bfloat16     # MXU operand dtype (accumulation stays f32)
_LANE = 128                       # vreg lane width
_M_TARGET = 512                   # target matmul M per decoder tile


def _vmem_limit_bytes():
    """Scoped-VMEM budget: ~75% of physical (48 MiB on v7x, ~96 MiB on v5e/v6e)."""
    try:
        cap = pltpu.get_tpu_info().vmem_capacity_bytes
    except Exception:
        cap = 64 * 1024 * 1024            # conservative v7x default
    return int(max(min(cap * 3 // 4, 100 * 1024 * 1024), 32 * 1024 * 1024))


def _pad_lane(c, lane=_LANE):
    return ((c + lane - 1) // lane) * lane


def _largest_divisor(n, cap, align=1):
    """Largest divisor of n that is <= cap and a multiple of `align`."""
    if n <= cap:
        return n
    for d in range(min(cap, n), 0, -1):
        if n % d == 0 and d % align == 0:
            return d
    # No aligned divisor <= cap: a full-array block is always layout-legal.
    # TODO(synk): pathological (prime) sizes fall back to one full block, which
    #             may exceed the VMEM budget for very large N.
    return n


def _encoder_row_tile(n, nlat, vmem_budget):
    """Row tile sized from a VMEM formula (f32 activations + bf16 MXU copies)."""
    per_row = 6 * (3 + 64 + 128 + nlat)                 # 4B f32 + 2B bf16 per channel
    weights = 2 * (3 * 64 + 64 * 128 + 128 * nlat)      # bf16 weights, single-buffered
    avail = max(vmem_budget // 2 - weights, 8 * per_row)
    cap = max(8, min(1024, avail // per_row))
    cap -= cap % 8
    return _largest_divisor(n, max(cap, 8), align=8)


def _mxu_dot(a, b):
    """bf16 MXU matmul with f32 accumulation."""
    return jnp.dot(a.astype(_COMPUTE_DTYPE), b.astype(_COMPUTE_DTYPE),
                   preferred_element_type=jnp.float32)


def _const_spec(shape, index_map):
    """BlockSpec for weights whose block index is (near-)constant: single buffer."""
    return pl.BlockSpec(shape, index_map, pipeline_mode=pl.Buffered(1))


# ------------------------------ encoder kernel ------------------------------

def _encoder_kernel(x_ref, w1_ref, b1_ref, w2_ref, b2_ref, w3_ref, b3_ref,
                    o_ref, acc_ref):
    k = pl.program_id(2)

    @pl.when(k == 0)
    def _():
        acc_ref[...] = jnp.full_like(acc_ref, -jnp.inf)

    h = x_ref[0]                                                   # (tn, 3)
    h = jnp.maximum(_mxu_dot(h, w1_ref[...]) + b1_ref[...], 0.0)   # conv1+bn1+relu
    h = jnp.maximum(_mxu_dot(h, w2_ref[...]) + b2_ref[...], 0.0)   # conv2+bn2+relu
    h = _mxu_dot(h, w3_ref[...]) + b3_ref[...]                     # conv3+bn3 (no relu)

    # fused global max over points (running max lives in VMEM scratch).
    acc_ref[...] = jnp.maximum(acc_ref[...], jnp.max(h, axis=0, keepdims=True))

    @pl.when(k == pl.num_programs(2) - 1)
    def _():
        o_ref[0] = acc_ref[...].astype(o_ref.dtype)


def encode(x, enc):
    """x: (B, N, 3) f32 -> latent (B, nlatent) f32."""
    B, N, _ = x.shape
    nlat = enc["w3"].shape[1]
    vmem_limit = _vmem_limit_bytes()

    tn = _encoder_row_tile(N, nlat, vmem_limit)
    total_tiles = max(N // tn, 1)
    # Extra parallel axis so both v7x TensorCores stay busy when B == 1.
    nsplit = 2 if (B == 1 and total_tiles >= 2 and total_tiles % 2 == 0) else 1
    ktiles = total_tiles // nsplit

    const = lambda b, s, k: (0, 0)

    pooled = pl.pallas_call(
        _encoder_kernel,
        out_shape=jax.ShapeDtypeStruct((B, nsplit, nlat), jnp.float32),
        grid_spec=pltpu.PrefetchScalarGridSpec(
            num_scalar_prefetch=0,
            grid=(B, nsplit, ktiles),
            in_specs=[
                pl.BlockSpec((1, tn, 3), lambda b, s, k: (b, s * ktiles + k, 0)),
                _const_spec(enc["w1"].shape, const),
                _const_spec(enc["b1"].shape, const),
                _const_spec(enc["w2"].shape, const),
                _const_spec(enc["b2"].shape, const),
                _const_spec(enc["w3"].shape, const),
                _const_spec(enc["b3"].shape, const),
            ],
            out_specs=pl.BlockSpec((1, 1, nlat), lambda b, s, k: (b, s, 0)),
            scratch_shapes=[pltpu.VMEM((1, nlat), jnp.float32)],
        ),
        compiler_params=pltpu.CompilerParams(
            dimension_semantics=("parallel", "parallel", "arbitrary"),
            vmem_limit_bytes=vmem_limit),
    )(x, enc["w1"], enc["b1"], enc["w2"], enc["b2"], enc["w3"], enc["b3"])

    pooled = jnp.max(pooled, axis=1)                               # (B, nlatent)
    # Hoisted latent Linear + bn4 + relu: one efficient batched GEMM in XLA
    # instead of an M=1 matmul per grid step inside the kernel.
    return jnp.maximum(jnp.dot(pooled, enc["wl"]) + enc["bl"], 0.0)


# ------------------------------ decoder kernel ------------------------------

def _decoder_kernel(patch_ref, latb_ref, w1a_ref, w2_ref, b2_ref,
                    w3_ref, b3_ref, w4_ref, b4_ref, o_ref):
    tb = latb_ref.shape[1]
    tp = patch_ref.shape[1]

    # layer 1: patch half computed once per tile (shared by every batch row),
    # latent half is the precomputed per-(patch, batch) bias latb.
    p1 = _mxu_dot(patch_ref[0], w1a_ref[0])                        # (tp, c1)
    lb = latb_ref[...][0]                                          # (tb, 1, c1)
    h = jnp.maximum(p1[None, :, :] + lb, 0.0)                      # (tb, tp, c1)
    h = h.reshape(tb * tp, -1)                                     # fold batch into M

    h = jnp.maximum(_mxu_dot(h, w2_ref[0]) + b2_ref[0], 0.0)       # conv2+bn2+relu
    h = jnp.maximum(_mxu_dot(h, w3_ref[0]) + b3_ref[0], 0.0)       # conv3+bn3+relu
    y = jnp.tanh(_mxu_dot(h, w4_ref[0]) + b4_ref[0])               # conv4 + tanh (EUP)
    o_ref[...] = y.reshape(tb, 1, tp, 3).astype(o_ref.dtype)


def decode(lat, patches, dec):
    """lat: (B, nlatent), patches: (npatch, P, dim) -> (B, npatch*P, 3)."""
    npatch, P, dim = patches.shape
    B = lat.shape[0]
    c1p = dec["w1a"].shape[2]
    vmem_limit = _vmem_limit_bytes()

    # Fold batch into the matmul M dimension: M = tb * tp, targeting ~512 rows.
    tp = _largest_divisor(P, _M_TARGET, align=8)
    tb = _largest_divisor(B, max(1, _M_TARGET // tp), align=1)

    # per-(patch, batch) latent contribution of decoder layer 1 (+ folded BN
    # bias): a tiny (B,nlatent)x(nlatent,c1) matmul per patch, computed once
    # instead of concatenating the broadcast latent onto every point.
    lat_bias = jnp.einsum("bn,pnc->pbc", lat, dec["w1b"]) + dec["b1"][:, None, :]
    lat_bias = lat_bias.reshape(npatch, B, 1, c1p)

    grid = (npatch, B // tb, P // tp)
    wmap = lambda p, b, j: (p, 0, 0)

    out = pl.pallas_call(
        _decoder_kernel,
        out_shape=jax.ShapeDtypeStruct((B, npatch, P, 3), jnp.float32),
        grid_spec=pltpu.PrefetchScalarGridSpec(
            num_scalar_prefetch=0,
            grid=grid,
            in_specs=[
                pl.BlockSpec((1, tp, dim), lambda p, b, j: (p, j, 0)),
                pl.BlockSpec((1, tb, 1, c1p), lambda p, b, j: (p, b, 0, 0)),
                _const_spec((1,) + dec["w1a"].shape[1:], wmap),
                _const_spec((1,) + dec["w2"].shape[1:], wmap),
                _const_spec((1,) + dec["b2"].shape[1:], wmap),
                _const_spec((1,) + dec["w3"].shape[1:], wmap),
                _const_spec((1,) + dec["b3"].shape[1:], wmap),
                _const_spec((1,) + dec["w4"].shape[1:], wmap),
                _const_spec((1,) + dec["b4"].shape[1:], wmap),
            ],
            # Output is emitted directly in its final (B, npatch, P, 3) layout,
            # so the reshape below is a free view (no XLA transpose pass).
            out_specs=pl.BlockSpec((tb, 1, tp, 3), lambda p, b, j: (b, p, j, 0)),
        ),
        compiler_params=pltpu.CompilerParams(
            dimension_semantics=("parallel", "parallel", "parallel"),
            vmem_limit_bytes=vmem_limit),
    )(patches, lat_bias, dec["w1a"], dec["w2"], dec["b2"],
      dec["w3"], dec["b3"], dec["w4"], dec["b4"])

    # matches torch.cat(outs, 2).transpose(2, 1): patch i -> points [i*P,(i+1)*P)
    return out.reshape(B, npatch * P, 3)


# ------------------------- parameter initialization ------------------------

def init_linear(key, cin, cout):
    k1, k2 = jax.random.split(key)
    bound = 1.0 / (cin ** 0.5)
    w = jax.random.uniform(k1, (cin, cout), minval=-bound, maxval=bound,
                           dtype=jnp.float32)
    b = jax.random.uniform(k2, (cout,), minval=-bound, maxval=bound,
                           dtype=jnp.float32)
    return w, b


def init_bn(key, c):
    k1, k2, k3, k4 = jax.random.split(key, 4)
    gamma = jax.random.uniform(k1, (c,), minval=0.5, maxval=1.5, dtype=jnp.float32)
    beta = 0.1 * jax.random.normal(k2, (c,), dtype=jnp.float32)
    mean = 0.1 * jax.random.normal(k3, (c,), dtype=jnp.float32)
    var = jax.random.uniform(k4, (c,), minval=0.5, maxval=1.5, dtype=jnp.float32)
    return gamma, beta, mean, var


def fold_bn(w, b, bn, eps=1e-5):
    gamma, beta, mean, var = bn
    scale = gamma / jnp.sqrt(var + eps)
    return w * scale[None, :], (b - mean) * scale + beta


def make_params(key, npoint, npatch, nlatent, dim):
    keys = iter(jax.random.split(key, 256))
    cd = _COMPUTE_DTYPE

    def conv_bn(cin, cout):
        w, b = init_linear(next(keys), cin, cout)
        bn = init_bn(next(keys), cout)
        return fold_bn(w, b, bn)

    # --- encoder (PointNetfeat): BN folded; conv weights bf16, hoisted wl f32 ---
    w1, b1 = conv_bn(3, 64)
    w2, b2 = conv_bn(64, 128)
    w3, b3 = conv_bn(128, nlatent)
    wl, bl = conv_bn(nlatent, nlatent)                 # Linear + bn4 folded (XLA)
    enc = {"w1": w1.astype(cd), "b1": b1[None, :],
           "w2": w2.astype(cd), "b2": b2[None, :],
           "w3": w3.astype(cd), "b3": b3[None, :],
           "wl": wl, "bl": bl}

    # --- decoders (mlpAdj): one weight set per patch, stacked for one kernel.
    # Channel widths are zero-padded to lane (128) multiples so MXU K/N passes
    # are full and stores are unmasked; padded channels stay exactly zero.
    nl2 = dim + nlatent
    c1, c2, c3 = nl2, nl2 // 2, nl2 // 4
    c1p, c2p, c3p = _pad_lane(c1), _pad_lane(c2), _pad_lane(c3)

    acc = {k: [] for k in ("w1a", "w1b", "b1", "w2", "b2",
                           "w3", "b3", "w4", "b4")}
    for _ in range(npatch):
        w1d, b1d = conv_bn(c1, c1)
        w2d, b2d = conv_bn(c1, c2)
        w3d, b3d = conv_bn(c2, c3)
        w4d, b4d = init_linear(next(keys), c3, 3)          # conv4: no BN, tanh
        acc["w1a"].append(jnp.zeros((dim, c1p), jnp.float32)
                          .at[:, :c1].set(w1d[:dim]))      # patch rows of W1
        acc["w1b"].append(jnp.zeros((nlatent, c1p), jnp.float32)
                          .at[:, :c1].set(w1d[dim:]))      # latent rows of W1
        acc["b1"].append(jnp.zeros((c1p,), jnp.float32).at[:c1].set(b1d))
        acc["w2"].append(jnp.zeros((c1p, c2p), jnp.float32)
                         .at[:c1, :c2].set(w2d))
        acc["b2"].append(jnp.zeros((1, c2p), jnp.float32).at[:, :c2].set(b2d[None, :]))
        acc["w3"].append(jnp.zeros((c2p, c3p), jnp.float32)
                         .at[:c2, :c3].set(w3d))
        acc["b3"].append(jnp.zeros((1, c3p), jnp.float32).at[:, :c3].set(b3d[None, :]))
        acc["w4"].append(jnp.zeros((c3p, 3), jnp.float32).at[:c3, :].set(w4d))
        acc["b4"].append(b4d[None, :])
    dec = {}
    for k, v in acc.items():
        arr = jnp.stack(v)                                 # (npatch, ...)
        if k in ("w1a", "w2", "w3", "w4"):
            arr = arr.astype(cd)
        dec[k] = arr

    # --- learnable patch grids, stored as (npatch, P, dim) ---
    P = npoint // npatch
    grids = []
    for _ in range(npatch):
        g = jax.random.uniform(next(keys), (dim, P), minval=0.0, maxval=1.0,
                               dtype=jnp.float32)
        g = g.at[2:, :].set(0.0)           # matches patch.data[:, 2:, :] = 0
        grids.append(g.T)
    patches = jnp.stack(grids)

    return {"enc": enc, "dec": dec, "patches": patches}


# ------------------------------ forward pass -------------------------------

def point_trans_mlp_adj(params, x):
    """x: (B, npoint, 3) f32 -> ((B, npoint, 3), [patch (P, dim) per patch])."""
    lat = encode(x, params["enc"])                         # (B, nlatent)
    out = decode(lat, params["patches"], params["dec"])    # (B, npoint, 3)
    patches = [params["patches"][i] for i in range(params["patches"].shape[0])]
    return out, patches


# ----------------------------------- main -----------------------------------

if __name__ == "__main__":
    # small config: npoint=16, npatch=2, nlatent=32, patchDim=2, batch=2
    B, NPOINT, NPATCH, NLATENT, DIM = 2, 16, 2, 32, 2

    key = jax.random.PRNGKey(0)
    kparam, kinput = jax.random.split(key)

    params = make_params(kparam, NPOINT, NPATCH, NLATENT, DIM)
    x = jax.random.normal(kinput, (B, NPOINT, 3), dtype=jnp.float32)

    out, patches = point_trans_mlp_adj(params, x)
    out = jax.block_until_ready(out)
    patches = [jax.block_until_ready(p) for p in patches]

    assert out.shape == (B, NPOINT, 3), out.shape
    assert len(patches) == NPATCH
    assert all(p.shape == (NPOINT // NPATCH, DIM) for p in patches)
    assert bool(jnp.all(jnp.isfinite(out)))
    print("KERNEL_OK")
</pallas_src>

<mosaic_0001>
module attributes {stable_mosaic.version = 11 : i64} {
  func.func @_encoder_kernel(%arg0: i32, %arg1: i32, %arg2: i32, %arg3: memref<1x16x3xf32, #tpu.memory_space<vmem>>, %arg4: memref<3x64xbf16, #tpu.memory_space<vmem>>, %arg5: memref<1x64xf32, #tpu.memory_space<vmem>>, %arg6: memref<64x128xbf16, #tpu.memory_space<vmem>>, %arg7: memref<1x128xf32, #tpu.memory_space<vmem>>, %arg8: memref<128x32xbf16, #tpu.memory_space<vmem>>, %arg9: memref<1x32xf32, #tpu.memory_space<vmem>>, %arg10: memref<1x1x32xf32, #tpu.memory_space<vmem>>, %arg11: memref<1x32xf32, #tpu.memory_space<vmem>>) attributes {dimension_semantics = [#tpu.dimension_semantics<parallel>, #tpu.dimension_semantics<parallel>, #tpu.dimension_semantics<arbitrary>], iteration_bounds = array<i64: 2, 1, 1>, scalar_prefetch = 0 : i64, scratch_operands = 1 : i64, tpu.core_type = #tpu.core_type<tc>, window_params = [{transform_indices = @transform_0, window_bounds = array<i64: 1, 16, 3>}, {pipeline_mode = #tpu.pipeline_mode<synchronous>, transform_indices = @transform_1, window_bounds = array<i64: 3, 64>}, {pipeline_mode = #tpu.pipeline_mode<synchronous>, transform_indices = @transform_2, window_bounds = array<i64: 1, 64>}, {pipeline_mode = #tpu.pipeline_mode<synchronous>, transform_indices = @transform_3, window_bounds = array<i64: 64, 128>}, {pipeline_mode = #tpu.pipeline_mode<synchronous>, transform_indices = @transform_4, window_bounds = array<i64: 1, 128>}, {pipeline_mode = #tpu.pipeline_mode<synchronous>, transform_indices = @transform_5, window_bounds = array<i64: 128, 32>}, {pipeline_mode = #tpu.pipeline_mode<synchronous>, transform_indices = @transform_6, window_bounds = array<i64: 1, 32>}, {transform_indices = @transform_7, window_bounds = array<i64: 1, 1, 32>}]} {
    %c0_i32 = arith.constant 0 : i32
    %0 = arith.cmpi eq, %arg2, %c0_i32 : i32
    %1 = arith.extui %0 : i1 to i32
    %c0_i32_0 = arith.constant 0 : i32
    %2 = arith.cmpi ne, %1, %c0_i32_0 : i32
    scf.if %2 {
      %cst_26 = arith.constant 0xFF800000 : f32
      %35 = vector.broadcast %cst_26 : f32 to vector<1x32xf32>
      %c0_27 = arith.constant 0 : index
      %c0_28 = arith.constant 0 : index
      %36 = vector.load %arg11[%c0_27, %c0_28] : memref<1x32xf32, #tpu.memory_space<vmem>>, vector<1x32xf32>
      tpu.vector_store %arg11[%c0_27, %c0_28], %35 {strides = array<i32>} : memref<1x32xf32, #tpu.memory_space<vmem>>, vector<1x32xf32>,
    } else {
    }
    %c0 = arith.constant 0 : index
    %c0_1 = arith.constant 0 : index
    %c0_2 = arith.constant 0 : index
    %3 = vector.load %arg3[%c0, %c0_1, %c0_2] : memref<1x16x3xf32, #tpu.memory_space<vmem>>, vector<1x16x3xf32>
    %4 = vector.shape_cast %3 : vector<1x16x3xf32> to vector<16x3xf32>
    %c0_3 = arith.constant 0 : index
    %c0_4 = arith.constant 0 : index
    %5 = vector.load %arg4[%c0_3, %c0_4] : memref<3x64xbf16, #tpu.memory_space<vmem>>, vector<3x64xbf16>
    %6 = arith.truncf %4 : vector<16x3xf32> to vector<16x3xbf16>
    %cst = arith.constant dense<0.000000e+00> : vector<16x64xf32>
    %7 = tpu.matmul %6, %5, %cst {dimension_numbers = #tpu.dot_dimension_numbers<[1], [0], [0], [1], [0, 0, 1, 1], [], []>} : vector<16x3xbf16>, vector<3x64xbf16>, vector<16x64xf32> -> vector<16x64xf32>
    %c0_5 = arith.constant 0 : index
    %c0_6 = arith.constant 0 : index
    %8 = vector.load %arg5[%c0_5, %c0_6] : memref<1x64xf32, #tpu.memory_space<vmem>>, vector<1x64xf32>
    %9 = vector.broadcast %8 : vector<1x64xf32> to vector<16x64xf32>
    %10 = arith.addf %7, %9 : vector<16x64xf32>
    %cst_7 = arith.constant 0.000000e+00 : f32
    %11 = vector.broadcast %cst_7 : f32 to vector<16x64xf32>
    %12 = arith.maximumf %10, %11 : vector<16x64xf32>
    %c0_8 = arith.constant 0 : index
    %c0_9 = arith.constant 0 : index
    %13 = vector.load %arg6[%c0_8, %c0_9] : memref<64x128xbf16, #tpu.memory_space<vmem>>, vector<64x128xbf16>
    %14 = arith.truncf %12 : vector<16x64xf32> to vector<16x64xbf16>
    %cst_10 = arith.constant dense<0.000000e+00> : vector<16x128xf32>
    %15 = tpu.matmul %14, %13, %cst_10 {dimension_numbers = #tpu.dot_dimension_numbers<[1], [0], [0], [1], [0, 0, 1, 1], [], []>} : vector<16x64xbf16>, vector<64x128xbf16>, vector<16x128xf32> -> vector<16x128xf32>
    %c0_11 = arith.constant 0 : index
    %c0_12 = arith.constant 0 : index
    %16 = vector.load %arg7[%c0_11, %c0_12] : memref<1x128xf32, #tpu.memory_space<vmem>>, vector<1x128xf32>
    %17 = vector.broadcast %16 : vector<1x128xf32> to vector<16x128xf32>
    %18 = arith.addf %15, %17 : vector<16x128xf32>
    %cst_13 = arith.constant 0.000000e+00 : f32
    %19 = vector.broadcast %cst_13 : f32 to vector<16x128xf32>
    %20 = arith.maximumf %18, %19 : vector<16x128xf32>
    %c0_14 = arith.constant 0 : index
    %c0_15 = arith.constant 0 : index
    %21 = vector.load %arg8[%c0_14, %c0_15] : memref<128x32xbf16, #tpu.memory_space<vmem>>, vector<128x32xbf16>
    %22 = arith.truncf %20 : vector<16x128xf32> to vector<16x128xbf16>
    %cst_16 = arith.constant dense<0.000000e+00> : vector<16x32xf32>
    %23 = tpu.matmul %22, %21, %cst_16 {dimension_numbers = #tpu.dot_dimension_numbers<[1], [0], [0], [1], [0, 0, 1, 1], [], []>} : vector<16x128xbf16>, vector<128x32xbf16>, vector<16x32xf32> -> vector<16x32xf32>
    %c0_17 = arith.constant 0 : index
    %c0_18 = arith.constant 0 : index
    %24 = vector.load %arg9[%c0_17, %c0_18] : memref<1x32xf32, #tpu.memory_space<vmem>>, vector<1x32xf32>
    %25 = vector.broadcast %24 : vector<1x32xf32> to vector<16x32xf32>
    %26 = arith.addf %23, %25 : vector<16x32xf32>
    %c0_19 = arith.constant 0 : index
    %c0_20 = arith.constant 0 : index
    %27 = vector.load %arg11[%c0_19, %c0_20] : memref<1x32xf32, #tpu.memory_space<vmem>>, vector<1x32xf32>
    %cst_21 = arith.constant dense<0xFF800000> : vector<32xf32>
    %28 = vector.multi_reduction <maximumf>, %26, %cst_21 [0] : vector<16x32xf32> to vector<32xf32>
    %29 = vector.shape_cast %28 : vector<32xf32> to vector<1x32xf32>
    %30 = arith.maximumf %27, %29 : vector<1x32xf32>
    %c0_22 = arith.constant 0 : index
    %c0_23 = arith.constant 0 : index
    %31 = vector.load %arg11[%c0_22, %c0_23] : memref<1x32xf32, #tpu.memory_space<vmem>>, vector<1x32xf32>
    tpu.vector_store %arg11[%c0_22, %c0_23], %30 {strides = array<i32>} : memref<1x32xf32, #tpu.memory_space<vmem>>, vector<1x32xf32>,
    %c0_i32_24 = arith.constant 0 : i32
    %32 = arith.cmpi eq, %arg2, %c0_i32_24 : i32
    %33 = arith.extui %32 : i1 to i32
    %c0_i32_25 = arith.constant 0 : i32
    %34 = arith.cmpi ne, %33, %c0_i32_25 : i32
    scf.if %34 {
      %c0_26 = arith.constant 0 : index
      %c0_27 = arith.constant 0 : index
      %35 = vector.load %arg11[%c0_26, %c0_27] : memref<1x32xf32, #tpu.memory_space<vmem>>, vector<1x32xf32>
      %c0_28 = arith.constant 0 : index
      %c0_29 = arith.constant 0 : index
      %c0_30 = arith.constant 0 : index
      %36 = vector.load %arg10[%c0_28, %c0_29, %c0_30] : memref<1x1x32xf32, #tpu.memory_space<vmem>>, vector<1x1x32xf32>
      %37 = vector.shape_cast %36 : vector<1x1x32xf32> to vector<1x32xf32>
      %38 = vector.shape_cast %35 : vector<1x32xf32> to vector<1x1x32xf32>
      tpu.vector_store %arg10[%c0_28, %c0_29, %c0_30], %38 {strides = array<i32>} : memref<1x1x32xf32, #tpu.memory_space<vmem>>, vector<1x1x32xf32>,
    } else {
    }
    return
  }
  func.func @transform_0(%arg0: i32, %arg1: i32, %arg2: i32) -> (i32, i32, i32) {
    %c1_i32 = arith.constant 1 : i32
    %0 = arith.muli %arg1, %c1_i32 : i32
    %1 = arith.addi %0, %arg2 : i32
    %c0_i32 = arith.constant 0 : i32
    %c0_i32_0 = arith.constant 0 : i32
    return %arg0, %1, %c0_i32 : i32, i32, i32
  }
  func.func @transform_1(%arg0: i32, %arg1: i32, %arg2: i32) -> (i32, i32) {
    %c0_i32 = arith.constant 0 : i32
    %c0_i32_0 = arith.constant 0 : i32
    %c0_i32_1 = arith.constant 0 : i32
    return %c0_i32, %c0_i32_0 : i32, i32
  }
  func.func @transform_2(%arg0: i32, %arg1: i32, %arg2: i32) -> (i32, i32) {
    %c0_i32 = arith.constant 0 : i32
    %c0_i32_0 = arith.constant 0 : i32
    %c0_i32_1 = arith.constant 0 : i32
    return %c0_i32, %c0_i32_0 : i32, i32
  }
  func.func @transform_3(%arg0: i32, %arg1: i32, %arg2: i32) -> (i32, i32) {
    %c0_i32 = arith.constant 0 : i32
    %c0_i32_0 = arith.constant 0 : i32
    %c0_i32_1 = arith.constant 0 : i32
    return %c0_i32, %c0_i32_0 : i32, i32
  }
  func.func @transform_4(%arg0: i32, %arg1: i32, %arg2: i32) -> (i32, i32) {
    %c0_i32 = arith.constant 0 : i32
    %c0_i32_0 = arith.constant 0 : i32
    %c0_i32_1 = arith.constant 0 : i32
    return %c0_i32, %c0_i32_0 : i32, i32
  }
  func.func @transform_5(%arg0: i32, %arg1: i32, %arg2: i32) -> (i32, i32) {
    %c0_i32 = arith.constant 0 : i32
    %c0_i32_0 = arith.constant 0 : i32
    %c0_i32_1 = arith.constant 0 : i32
    return %c0_i32, %c0_i32_0 : i32, i32
  }
  func.func @transform_6(%arg0: i32, %arg1: i32, %arg2: i32) -> (i32, i32) {
    %c0_i32 = arith.constant 0 : i32
    %c0_i32_0 = arith.constant 0 : i32
    %c0_i32_1 = arith.constant 0 : i32
    return %c0_i32, %c0_i32_0 : i32, i32
  }
  func.func @transform_7(%arg0: i32, %arg1: i32, %arg2: i32) -> (i32, i32, i32) {
    %c0_i32 = arith.constant 0 : i32
    %c0_i32_0 = arith.constant 0 : i32
    return %arg0, %arg1, %c0_i32 : i32, i32, i32
  }
}

</mosaic_0001>

<bundles_post_ra>
// kernel: tpu_custom_call.1
= control target key start
LH: loop header
LB: loop body
LE: loop exit
PB: predicated region body
PF: predicated region fallthrough
CT: control target
= control target key end

     0   :  { %12 = vsyncpa [#allocation4], 0  ;;  %s1158_s0 = inlined_call_operand.vmem [shape: f32[2,16,3], index: 0, kind: input, shape index: {}]   ;;  %s1159_s1 = inlined_call_operand.vmem [shape: bf16[3,64], index: 1, kind: input, shape index: {}]   ;;  %s1160_s2 = inlined_call_operand.vmem [shape: f32[1,64], index: 2, kind: input, shape index: {}]   ;;  %s1161_s3 = inlined_call_operand.vmem [shape: bf16[64,128], index: 3, kind: input, shape index: {}]   ;;  %s1162_s4 = inlined_call_operand.vmem [shape: f32[1,128], index: 4, kind: input, shape index: {}]   ;;  %s1163_s5 = inlined_call_operand.vmem [shape: bf16[128,32], index: 5, kind: input, shape index: {}]   ;;  %s1164_s6 = inlined_call_operand.vmem [shape: f32[1,32], index: 6, kind: input, shape index: {}]   ;;  %s1165_s7 = inlined_call_operand.hbm [shape: f32[2,1,32], index: 7, kind: output, shape index: {}]  }
   0x1   :  { %14 = vsyncpa [#allocation4 + $0x1], 0  ;;  %s976_s24 = smov 0   ;;  %s978_s25 = smov 0  }
   0x2   :  { %s980_s26 = smov 0   ;;  %s982_s27 = smov 0  }
   0x3   :  { %s984_s28 = smov 0   ;;  %s986_s29 = smov 0  }
   0x4 LB: > { %s698_s30 = sadd.s32 4294967295, %s929_s29   ;;  %s699_s8 = sadd.s32 4294967294, %s929_s29   ;;  %s929_s29 = sphi %s986_s29, %s20_s29   ;;  %s925_s28 = sphi %s984_s28, %s1172_s28   ;;  %s921_s27 = sphi %s982_s27, %s1171_s27   ;;  %s917_s26 = sphi %s980_s26, %s1170_s26   ;;  %s913_s25 = sphi %s978_s25, %s1169_s25   ;;  %s909_s24 = sphi %s976_s24, %s1168_s24  }
   0x5   : > { %s39_s9 = sadd.s32 1, %s925_s28  ;;  %s204_s10 = sadd.s32 1, %s917_s26 }
   0x6   : > { %p41_p0 = scmp.ge.s32.totalorder %s39_s9, 2  ;;  %p214_p1 = scmp.ne.s32.totalorder %s917_s26, %s913_s25 }
   0x7   : > { %p215_p2 = scmp.eq.s32.totalorder %s698_s30, 1  ;;  %p220_p3 = scmp.ne.s32.totalorder %s913_s25, %s909_s24 }
   0x8   : > { %s1174_s9 = smov (%p41_p0, %s39_s9), 0  ;;  %p221_p5 = scmp.eq.s32.totalorder %s699_s8, 1 }
   0x9   : > { %p1016_p4 = por %p215_p2, %p214_p1  ;;  %s199_s12 = ssub.s32 %s925_s28, %s1174_s9 }
   0xa   : > { %p702_p6 = scmp.ge.s32.totalorder %s929_s29, 1  ;;  %p202_p7 = scmp.eq.s32.totalorder %s199_s12, 0 }
   0xb   : > { %p1023_p8 = por %p221_p5, %p220_p3  ;;  %p272_p9 = scmp.lt.s32.totalorder %s929_s29, 3 }
   0xc   : > { %s1029_s14 = scalar_select %p202_p7, %s917_s26, %s204_s10  }
   0xd   : > { %p273_p10 = pnand %p702_p6, %p272_p9 }
   0xe   : > { %v329_v0 = vld [vmem:[%s1159_s1] sm:$0x3] (!%p273_p10)  ;;  %vm342_vm0 = vcmask (!%p273_p10), 1040384   ;;  %vm343_vm1 = vcmask (!%p273_p10), 1041408   ;;  %v931_v1 = vmov (!%p273_p10), 0.0   ;;  %v932_v2 = vmov (!%p273_p10), 65535  }
   0xf   : > { %276 = sbr.rel (%p273_p10) target bundleno = 724 (0x2d4), region = 48  ;;  %742 = vmatprep.subr.bf16.mxu1 (!%p273_p10), %v931_v1  ;;  %v344_v3 = vsel (!%p273_p10), %vm342_vm0, 4294967295, %v932_v2  ;;  %p310_p11 = scmp.lt.s32.totalorder (!%p273_p10), %s921_s27, 1  ;;  %760 = vmatprep.subr.bf16.mxu0 (!%p273_p10), %v931_v1  ;;  %vm933_vm2 = vmmov (!%p273_p10), 0   ;;  %v839_v6 = vld [vmem:[%s1161_s3] sm:$0xff] (!%p273_p10)   ;;  %vm338_vm3 = vcmask (!%p273_p10), 23552  }
  0x10   : > { %v345_v4 = vsel (!%p273_p10), %vm343_vm1, %v344_v3, 0  ;;  %744 = vmatprep.mubr.msk.bf16.mxu1 (!%p273_p10), %vm933_vm2, %v931_v1  ;;  %776 = vmatprep.mubr.msk.bf16.mxu0 (!%p273_p10), %vm933_vm2, %v931_v1  ;;  %v840_v10 = vld [vmem:[%s1161_s3 + $0x8] sm:$0xff] (!%p273_p10)   ;;  %v841_v11 = vld [vmem:[%s1161_s3 + $0x10] sm:$0xff] (!%p273_p10)   ;;  %v842_v12 = vld [vmem:[%s1161_s3 + $0x18] sm:$0xff] (!%p273_p10)   ;;  %vm432_vm4 = vcmask (!%p273_p10), 523264   ;;  %vm325_vm5 = vcmask (!%p273_p10), 253952  }
  0x11   : > { %v347_v5 = vand.u32 (!%p273_p10), %v345_v4, %v329_v0  ;;  %v843_v13 = vld [vmem:[%s1163_s5] sm:$0xff] (!%p273_p10)   ;;  %v844_v14 = vld [vmem:[%s1163_s5 + $0x8] sm:$0xff] (!%p273_p10)   ;;  %v845_v15 = vld [vmem:[%s1163_s5 + $0x10] sm:$0xff] (!%p273_p10)   ;;  %v934_v41 = vmov (!%p273_p10), -inf   ;;  %vm593_vm6 = vcmask (!%p273_p10), 261120   ;;  %s306_s10 = sand.u32 (!%p273_p10), 1, %s913_s25  }
  0x12   : > { %761 = vmatpush3.bf16.msra.mxu0 (!%p273_p10), %v843_v13  ;;  %v846_v16 = vld [vmem:[%s1163_s5 + $0x18] sm:$0xff] (!%p273_p10)   ;;  %v847_v17 = vld [vmem:[%s1163_s5 + $0x20] sm:$0xff] (!%p273_p10)   ;;  %v848_v18 = vld [vmem:[%s1163_s5 + $0x28] sm:$0xff] (!%p273_p10)   ;;  %326 = vst.msk [vmem:[#allocation2] sm:$0x1] (!%p273_p10), %vm325_vm5, %v934_v41  ;;  %s722_s12 = sshll.u32 (!%p273_p10), %s921_s27, 4 }
  0x13   : > { %743 = vmatpush3.bf16.msra.mxu1 (!%p273_p10), %v347_v5  ;;  %762 = vmatprep.subr.bf16.mxu0 (!%p273_p10), %v931_v1  ;;  %v705_v19 = vld [vmem:[%s1160_s2] ss:$0 sm:$0xff] (!%p273_p10)  ;;  %v849_v29 = vld [vmem:[%s1163_s5 + $0x30] sm:$0xff] (!%p273_p10)   ;;  %v850_v30 = vld [vmem:[%s1163_s5 + $0x38] sm:$0xff] (!%p273_p10)   ;;  %s307_s15 = scalar_lea.vmem (!%p273_p10), [#allocation3], %s306_s10  ;;  %s1110_s19 = scalar_lea.hbm (!%p273_p10), %s1165_s7, %s722_s12 }
  0x14   : > { %748 = vmatprep.subr.bf16.mxu1 (!%p273_p10), %v931_v1  ;;  %v707_v31 = vld [vmem:[%s1162_s4] ss:$0 sm:$0xff] (!%p273_p10)  ;;  %s625_s16 = sshll.u32 (!%p273_p10), %s307_s15, 4  ;;  %s612_s20 = scalar_lea.sflag (!%p273_p10), [#allocation4], %s306_s10  ;;  %s1112_s16 = int_to_ptr.vmem [resolvable:$true] %s625_s16 }
  0x15   : > { %v713_v42 = vld [vmem:[%s1164_s6] ss:$0 sm:$0xff] (!%p273_p10)  ;;  %s851_s21 = scalar_lea.vmem (!%p273_p10), %s1112_s16, 16 }
  0x16   : > { %s311_s17 = scalar_select %p310_p11, %s921_s27, 1  ;;  %763 = vmatpush3.bf16.msra.mxu0 %v844_v14 }
  0x17   : > { %764 = vmatprep.subr.bf16.mxu0 %v931_v1  ;;  %p852_p12 = scmp.ne.s32.totalorder %s1112_s16, %s851_s21  ;;  %s935_s27 = smov [#allocation3]  }
  0x18   : > { %s725_s18 = sshll.u32 %s311_s17, 4  ;;  %s855_s22 = sshll.u32 %s935_s27, 4  ;;  %s856_s22 = int_to_ptr.vmem [resolvable:$false] %s855_s22 }
  0x19   : > { %s317_s23 = scalar_lea.vmem %s1158_s0, %s725_s18  ;;  %v592_v57 = vld [vmem:[#allocation2] sm:$0x1]  ;;  %p853_p13 = pnand %p852_p12, %p1016_p4 }
  0x1a   : > { %v327_v7 = vld [vmem:[%s317_s23] sm:$0xff]  ;;  %v328_v8 = vld [vmem:[%s317_s23 + $0x8] sm:$0xff]  ;;  %765 = vmatpush3.bf16.msra.mxu0 %v845_v15  ;;  %s857_s23 = scalar_lea.vmem %s856_s22, 32  ;;  %p858_p1 = scmp.lt.s32.totalorder %s1112_s16, %s856_s22 }
  0x1b   : > { %v330_v9 = vpack.c.bf16 %v328_v8, %v327_v7  ;;  %766 = vmatprep.subr.bf16.mxu0 %v931_v1  ;;  %p854_p0 = pneg %p853_p13  ;;  %p859_p2 = scmp.lt.s32.totalorder %s857_s23, %s851_s21 }
  0x1d   : > { %745 = vmatmul.mubr.msk.bf16.vlgmr.msra.gmra.mrb[0].mxu1 %vm338_vm3, %v330_v9  ;;  %p860_p3 = por %p859_p2, %p858_p1 }
  0x1e   : > { %749 = vmatpush3.bf16.msra.mxu1 %v839_v6  ;;  %756 = vmatprep.mubr.msk.bf16.mxu1 %vm933_vm2, %v931_v1 }
  0x1f   : > { %750 = vmatprep.subr.bf16.mxu1 %v931_v1  ;;  %767 = vmatpush3.bf16.msra.mxu0 %v846_v16  ;;  %p861_p5 = pnand %p860_p3, %p854_p0 }
  0x20   : > { %768 = vmatprep.subr.bf16.mxu0 %v931_v1 }
  0x22   : > { %751 = vmatpush3.bf16.msra.mxu1 %v840_v10 }
  0x23   : > { %752 = vmatprep.subr.bf16.mxu1 %v931_v1  ;;  %769 = vmatpush3.bf16.msra.mxu0 %v847_v17 }
  0x24   : > { %770 = vmatprep.subr.bf16.mxu0 %v931_v1 }
  0x26   : > { %753 = vmatpush3.bf16.msra.mxu1 %v841_v11 }
  0x27   : > { %754 = vmatprep.subr.bf16.mxu1 %v931_v1  ;;  %771 = vmatpush3.bf16.msra.mxu0 %v848_v18 }
  0x28   : > { %772 = vmatprep.subr.bf16.mxu0 %v931_v1 }
  0x2a   : > { %755 = vmatpush3.bf16.msra.mxu1 %v842_v12 }
  0x2b   : > { %773 = vmatpush3.bf16.msra.mxu0 %v849_v29 }
  0x2c   : > { %774 = vmatprep.subr.bf16.mxu0 %v931_v1 }
  0x2f   : > { %775 = vmatpush3.bf16.msra.mxu0 %v850_v30 }
  0xf0   : > { %v383_v20 = vpop.f32.mrb[0].mxu1 }
  0xf1   : > { %v384_v21 = vadd.f32 %v705_v19, %v383_v20  ;;  %v746_v22 = vpop.f32.mrb[1].mxu1 }
  0xf2   : > { %v386_v23 = vpop.f32.mrb[2].mxu1 }
  0xf3   : > { %v387_v24 = vadd.f32 %v705_v19, %v386_v23  ;;  %v747_v25 = vpop.f32.mrb[3].mxu1  ;;  %v390_v26 = vmax.f32 %v384_v21, 0.0 }
  0xf5   : > { %v391_v27 = vmax.f32 %v387_v24, 0.0 }
  0xf7   : > { %v400_v28 = vpack.c.bf16 %v391_v27, %v390_v26 }
  0xf9   : > { %757 = vmatmul.mubr.msk.bf16.vlgmr.msra.gmra.mrb[4].mxu1 %vm432_vm4, %v400_v28 }
 0x1cc   : > { %v470_v32 = vpop.f32.mrb[4].mxu1 }
 0x1cd   : > { %v471_v33 = vadd.f32 %v707_v31, %v470_v32  ;;  %v758_v34 = vpop.f32.mrb[5].mxu1 }
 0x1ce   : > { %v473_v35 = vpop.f32.mrb[6].mxu1 }
 0x1cf   : > { %v474_v36 = vadd.f32 %v707_v31, %v473_v35  ;;  %v759_v37 = vpop.f32.mrb[7].mxu1  ;;  %v477_v38 = vmax.f32 %v471_v33, 0.0 }
 0x1d1   : > { %v478_v39 = vmax.f32 %v474_v36, 0.0 }
 0x1d3   : > { %v495_v40 = vpack.c.bf16 %v478_v39, %v477_v38 }
 0x1d5   : > { %777 = vmatmul.mubr.bf16.vlgmr.msra.gmra.mrb[0].mxu0 %v495_v40 }
 0x2a8   : > { %v585_v43 = vpop.f32.mrb[0].mxu0 }
 0x2a9   : > { %v586_v44 = vadd.f32 %v713_v42, %v585_v43  ;;  %v778_v45 = vpop.f32.mrb[1].mxu0 }
 0x2aa   : > { %v588_v46 = vpop.f32.mrb[2].mxu0 }
 0x2ab   : > { %v589_v47 = vadd.f32 %v713_v42, %v588_v46  ;;  %v779_v48 = vpop.f32.mrb[3].mxu0  ;;  %v594_v49 = vsel %vm593_vm6, %v586_v44, -inf }
 0x2ad   : > { %v595_v50 = vsel %vm593_vm6, %v589_v47, -inf }
 0x2ae   : > { %v596_v51 = vmax.f32 %v594_v49, %v595_v50 }
 0x2b0   : > { %v597_v52 = vrot.slane %v596_v51, 4 }
 0x2b2   : > { %v598_v53 = vmax.f32 %v596_v51, %v597_v52 }
 0x2b4   : > { %v599_v54 = vrot.slane %v598_v53, 2 }
 0x2b6   : > { %v600_v55 = vmax.f32 %v598_v53, %v599_v54 }
 0x2b8   : > { %v601_v56 = vrot.slane %v600_v55, 1 }
 0x2ba   : > { %v602_v58 = vmax.f32 %v600_v55, %v601_v56 }
 0x2bc   : > { %v603_v59 = vmax.f32 %v592_v57, %v602_v58 }
 0x2be   : > { %605 = vst.msk [vmem:[#allocation2] sm:$0x1] %vm325_vm5, %v603_v59 }
 0x2c5   : > { %v609_v60 = vld [vmem:[#allocation2] sm:$0x1] }
 0x2c6   : > { %610 = vst.msk [vmem:[%s307_s15] sm:$0x1] %vm325_vm5, %v609_v60 }
 0x2c7   : > { %864 = shalt.err (!%p861_p5)
}
 0x2c8   : > { %s865_s30 = scalar_lea.hbm %s1110_s19, 16  ;;  %s869_s12 = scalar_lea.hbm %s1165_s7, 32 }
 0x2c9   : > { %p866_p6 = scmp.ne.s32.totalorder %s1110_s19, %s865_s30  ;;  %p870_p10 = scmp.lt.u32.totalorder %s1110_s19, %s1165_s7 }
 0x2ca   : > { %p871_p11 = scmp.lt.u32.totalorder %s869_s12, %s865_s30  ;;  %p873_p13 = scmp.lt.u32.totalorder %s865_s30, %s1110_s19 }
 0x2cb   : > { %p867_p7 = pnand %p866_p6, %p1016_p4 }
 0x2cc   : > { %p872_p12 = por %p871_p11, %p870_p10 }
 0x2cd   : > { %p868_p9 = pneg %p867_p7 }
 0x2ce   : > { %p874_p0 = por %p873_p13, %p872_p12 }
 0x2d0   : > { %p875_p1 = pnand %p874_p0, %p868_p9 }
 0x2d2   : > { %878 = shalt.err (!%p875_p1)
}
 0x2d3   : > { %780 = dma.vmem_to_hbm [thread:$0]  (%p1016_p4), %s1112_s16, 16, %s1110_s19, %s612_s20  }
 0x2d4 PF: > { %p786_p2 = scmp.ge.s32.totalorder %s929_s29, 2  ;;  %s637_s18 = sand.u32 1, %s909_s24  }
 0x2d5   : > { %s638_s21 = scalar_lea.sflag [#allocation4], %s637_s18 }
 0x2d6   : > { %p783_p3 = pnand %p786_p2, %p1023_p8 }
 0x2d8   : > { %904 = dma.done.wait (!%p783_p3), %s638_s21, 16  }
 0x2d9   : > { %906 = vsyncadd (!%p783_p3), %s638_s21, 4294967280  ;;  %s20_s29 = sadd.s32 1, %s929_s29   ;;  %s1168_s24 = smov %s913_s25 }
 0x2da   : > { %p17_p5 = scmp.ge.s32.totalorder %s20_s29, 4   ;;  %s1169_s25 = smov %s917_s26 }
 0x2db   : > { %s1170_s26 = smov %s1029_s14  ;;  %s1171_s27 = smov %s925_s28 }
 0x2dc   : > { %s1172_s28 = smov %s1174_s9  ;;  %19 = sbr.rel (!%p17_p5) target bundleno = 4 (0x4), region = 91 }
 0x2e3   :  { %642 = vsyncpa [#allocation4], 1 }
 0x2e4   :  { %644 = vsyncpa [#allocation4 + $0x1], 1 }

</bundles_post_ra>
